<compile_context>
chip_gen: v5e
topology: v5e:2x2
jax: 0.10.0
libtpu: 0.0.40
codegen_flags: <defaults>
</compile_context>

<pallas_src>
import functools

import jax
import jax.numpy as jnp
from jax.experimental import pallas as pl
from jax.experimental.pallas import tpu as pltpu

ALPHA = 0.5
GAMMA = 0.5
_LANE = 128


def _round_up(x, m):
    return -(-x // m) * m


def _sublane_multiple(dtype):
    # Native sublane packing of the second-minor dim: 4B -> 8, 2B -> 16, 1B -> 32.
    return {4: 8, 2: 16, 1: 32}[jnp.dtype(dtype).itemsize]


def _pow_one_minus_p(p, alpha):
    """Statically specialized (1 - p)^alpha (generic pow = exp+log on the one EUP slot)."""
    q = 1.0 - p
    if alpha == 0.0:
        return jnp.ones_like(p)
    if alpha == 0.5:
        return jnp.sqrt(q)
    if alpha == 1.0:
        return q
    if alpha == 2.0:
        return q * q
    return jnp.power(q, alpha)


def _dice_kernel(pred_ref, true_ref, num_ref, den_ref, num_acc, den_acc, *, alpha):
    k = pl.program_id(2)  # feature-chunk (reduction) axis, innermost

    @pl.when(k == 0)
    def _():
        num_acc[...] = jnp.zeros_like(num_acc)
        den_acc[...] = jnp.zeros_like(den_acc)

    p = pred_ref[...].astype(jnp.float32)   # (rg, ts, 128)
    t = true_ref[...].astype(jnp.float32)   # (rg, ts, 128)

    wp = _pow_one_minus_p(p, alpha) * p     # shared subexpression
    wpt = wp * t
    wpd = wp + t

    rg, ts, lane = p.shape
    if ts == 8:
        # Tile already matches the (rg, 8, 128) accumulator: pure vadds, no reshape.
        num_acc[...] += wpt
        den_acc[...] += wpd
    else:
        # Fold groups of 8 sublanes only (tile-aligned reshape, no cross-lane work);
        # the cross-sublane reduce is deferred to the finalize block below.
        num_acc[...] += jnp.sum(wpt.reshape(rg, ts // 8, 8, lane), axis=1)
        den_acc[...] += jnp.sum(wpd.reshape(rg, ts // 8, 8, lane), axis=1)

    @pl.when(k == pl.num_programs(2) - 1)
    def _():
        # One XLU pass per group; outputs stay lane-dense (rg, 128).
        num_ref[...] = jnp.sum(num_acc[...], axis=1)
        den_ref[...] = jnp.sum(den_acc[...], axis=1)


def binary_dice_loss(y_pred, y_true, alpha=ALPHA, gamma=GAMMA, reduction='mean',
                     input_vmem_budget=None):
    """Binary dice loss matching the reference torch forward.

    y_pred must hold probabilities in [0, 1] (no softmax/sigmoid is applied, matching
    the torch forward); otherwise pow(1 - p, alpha) produces NaN.
    y_true may be float32/bf16/int8/bool (0/1 labels); narrow dtypes are streamed
    as-is and cast to f32 on-chip, which cuts HBM traffic on this mem-bound kernel.
    """
    assert y_pred.shape == y_true.shape
    n = y_pred.shape[0]

    def canon(x):
        if x.dtype == jnp.bool_:
            return x.astype(jnp.int8)        # Mosaic-friendly, values preserved
        if jnp.dtype(x.dtype).itemsize > 4:  # f64/i64 (x64 mode) -> f32
            return x.astype(jnp.float32)
        return x

    # Flatten like torch's view(batch, -1); keep (possibly narrow) storage dtypes.
    y_pred = canon(y_pred).reshape(n, -1)
    y_true = canon(y_true).reshape(n, -1)
    d = y_pred.shape[1]

    ip = jnp.dtype(y_pred.dtype).itemsize
    it = jnp.dtype(y_true.dtype).itemsize
    sub = max(_sublane_multiple(y_pred.dtype), _sublane_multiple(y_true.dtype))

    # Generation-aware input budget: ~cap/4 (v5e/v6e 128 MiB -> 32 MiB, v7x 64 MiB -> 16 MiB).
    if input_vmem_budget is None:
        try:
            vmem_cap = int(pltpu.get_tpu_info().vmem_capacity_bytes)
        except Exception:
            vmem_cap = 64 << 20
        input_vmem_budget = int(min(32 << 20, max(8 << 20, vmem_cap // 4)))
    budget = int(input_vmem_budget)

    rows = -(-d // _LANE)                 # feature dim folded to (rows, 128)
    rows_full = _round_up(rows, sub)      # respect narrow-dtype sublane packing
    # Per batch-row VMEM overhead: two (8,128) f32 scratch accumulators (single buffer)
    # + two (1,128) f32 output rows (double buffered by the pipeline).
    acc_row_bytes = 2 * 8 * _LANE * 4 + 2 * 2 * _LANE * 4
    # Per batch-row cost of streaming the full feature strip, double buffered.
    full_row_cost = 2 * rows_full * _LANE * (ip + it) + acc_row_bytes

    # --- adaptive row-group size rg (layout needs rg % 8 == 0 or rg == n_total) ---
    if n <= 8 or (n < 16 and n * full_row_cost <= budget):
        rg = n                                            # one group, full batch extent
    elif 8 * full_row_cost <= budget:
        rg_cap = (budget // full_row_cost) // 8 * 8       # >= 8 here
        g = max(2, -(-n // rg_cap))                       # >=2 groups for megacore
        rg = _round_up(-(-n // g), 8)                     # balanced, minimal padding
    else:
        rg = n if n <= 64 else 8                          # feature-chunked path

    num_groups = -(-n // rg)
    n_total = num_groups * rg

    # --- feature tiling: full strip if it fits, else budget-capped chunks ---
    if rg * full_row_cost <= budget:
        ts = rows_full
    else:
        ts_cap = (budget - rg * acc_row_bytes) // (2 * rg * _LANE * (ip + it))
        ts = max(sub, min(ts_cap, rows_full) // sub * sub)
    num_chunks = -(-rows_full // ts)
    rows_padded = num_chunks * ts

    # --- 2-way feature split so v7x megacore stays busy when there is only one
    # row group (n == 1); harmless on single-core chips.
    n_splits = 1
    if num_groups == 1 and num_chunks >= 2:
        if num_chunks % 2 == 0:
            n_splits = 2
        elif num_chunks >= 9:             # pad one zero chunk only when waste is small
            n_splits = 2
            num_chunks += 1
            rows_padded = num_chunks * ts
    cps = num_chunks // n_splits          # chunks per split

    # --- zero padding (exact: p=0, t=0 contribute 0 to both sums) ---
    d_padded = rows_padded * _LANE
    if d_padded != d:
        y_pred = jnp.pad(y_pred, ((0, 0), (0, d_padded - d)))
        y_true = jnp.pad(y_true, ((0, 0), (0, d_padded - d)))
    if n_total != n:
        y_pred = jnp.pad(y_pred, ((0, n_total - n), (0, 0)))
        y_true = jnp.pad(y_true, ((0, n_total - n), (0, 0)))
    y_pred = y_pred.reshape(n_total, rows_padded, _LANE)
    y_true = y_true.reshape(n_total, rows_padded, _LANE)

    # Explicit VMEM limit: never clamped below the actual requirement (+ headroom).
    in_bytes = 2 * rg * ts * _LANE * (ip + it)
    vmem_limit = int(max(in_bytes + rg * acc_row_bytes + (4 << 20), 16 << 20))

    kernel = functools.partial(_dice_kernel, alpha=float(alpha))
    part_shape = jax.ShapeDtypeStruct((n_splits, n_total, _LANE), jnp.float32)

    num_part, den_part = pl.pallas_call(
        kernel,
        out_shape=(part_shape, part_shape),
        grid_spec=pltpu.PrefetchScalarGridSpec(
            num_scalar_prefetch=0,
            grid=(n_splits, num_groups, cps),
            in_specs=[
                pl.BlockSpec((rg, ts, _LANE), lambda s, i, k: (i, s * cps + k, 0)),
                pl.BlockSpec((rg, ts, _LANE), lambda s, i, k: (i, s * cps + k, 0)),
            ],
            out_specs=[
                pl.BlockSpec((None, rg, _LANE), lambda s, i, k: (s, i, 0)),
                pl.BlockSpec((None, rg, _LANE), lambda s, i, k: (s, i, 0)),
            ],
            scratch_shapes=[
                pltpu.VMEM((rg, 8, _LANE), jnp.float32),   # numerator partials
                pltpu.VMEM((rg, 8, _LANE), jnp.float32),   # denominator partials
            ],
        ),
        compiler_params=pltpu.CompilerParams(
            dimension_semantics=("parallel", "parallel", "arbitrary"),
            vmem_limit_bytes=vmem_limit,
        ),
    )(y_pred, y_true)

    # Tiny finalize in JAX: fold splits + lanes, apply gamma smoothing and the ratio.
    num = 2.0 * jnp.sum(num_part, axis=(0, 2)) + gamma     # (n_total,)
    den = jnp.sum(den_part, axis=(0, 2)) + gamma           # (n_total,)
    loss = (1.0 - num / den)[:n]                           # slice padded rows BEFORE reducing

    if reduction == 'mean':
        return jnp.mean(loss)
    elif reduction == 'sum':
        return jnp.sum(loss)
    else:
        return loss


def _reference(y_pred, y_true, alpha=ALPHA, gamma=GAMMA, reduction='mean'):
    n = y_pred.shape[0]
    p = y_pred.reshape(n, -1).astype(jnp.float32)
    t = y_true.reshape(n, -1).astype(jnp.float32)
    num = jnp.sum(2.0 * jnp.power(1.0 - p, alpha) * p * t, axis=1) + gamma
    den = jnp.sum(jnp.power(1.0 - p, alpha) * p + t, axis=1) + gamma
    loss = 1.0 - num / den
    if reduction == 'mean':
        return jnp.mean(loss)
    if reduction == 'sum':
        return jnp.sum(loss)
    return loss


if __name__ == "__main__":
    key = jax.random.PRNGKey(0)
    k1, k2, k3, k4, k5, k6 = jax.random.split(key, 6)

    # 1) Module-shaped case: f32 probabilities, narrow int8 binary targets.
    y_pred = jax.random.uniform(k1, (2, 4, 16, 16), dtype=jnp.float32)
    y_true = (jax.random.uniform(k2, (2, 4, 16, 16)) > 0.5).astype(jnp.int8)
    out = jax.block_until_ready(binary_dice_loss(y_pred, y_true))
    ref = _reference(y_pred, y_true)
    assert jnp.allclose(out, ref, atol=1e-5, rtol=1e-5), (out, ref)

    # 2) Multi-row-group path (n > 8, f32/f32, reduction='none').
    y_pred2 = jax.random.uniform(k3, (16, 8, 32), dtype=jnp.float32)
    y_true2 = (jax.random.uniform(k4, (16, 8, 32)) > 0.5).astype(jnp.float32)
    out2 = jax.block_until_ready(binary_dice_loss(y_pred2, y_true2, reduction='none'))
    ref2 = _reference(y_pred2, y_true2, reduction='none')
    assert jnp.allclose(out2, ref2, atol=1e-5, rtol=1e-5), (out2, ref2)

    # 3) Feature-chunked + 2-way split path (n == 1), forced via a tiny VMEM budget.
    y_pred3 = jax.random.uniform(k5, (1, 48 * 1024), dtype=jnp.float32)
    y_true3 = (jax.random.uniform(k6, (1, 48 * 1024)) > 0.5).astype(jnp.int8)
    out3 = jax.block_until_ready(
        binary_dice_loss(y_pred3, y_true3, input_vmem_budget=256 * 1024))
    ref3 = _reference(y_pred3, y_true3)
    assert jnp.allclose(out3, ref3, atol=1e-4, rtol=1e-4), (out3, ref3)

    print("KERNEL_OK")
</pallas_src>

<mosaic_0001>
module attributes {stable_mosaic.version = 11 : i64} {
  func.func @_dice_kernel(%arg0: i32, %arg1: i32, %arg2: i32, %arg3: memref<2x32x128xf32, #tpu.memory_space<vmem>>, %arg4: memref<2x32x128xi8, #tpu.memory_space<vmem>>, %arg5: memref<1x2x128xf32, #tpu.memory_space<vmem>>, %arg6: memref<1x2x128xf32, #tpu.memory_space<vmem>>, %arg7: memref<2x8x128xf32, #tpu.memory_space<vmem>>, %arg8: memref<2x8x128xf32, #tpu.memory_space<vmem>>) attributes {dimension_semantics = [#tpu.dimension_semantics<parallel>, #tpu.dimension_semantics<parallel>, #tpu.dimension_semantics<arbitrary>], iteration_bounds = array<i64: 1, 1, 1>, scalar_prefetch = 0 : i64, scratch_operands = 2 : i64, tpu.core_type = #tpu.core_type<tc>, window_params = [{transform_indices = @transform_0, window_bounds = array<i64: 2, 32, 128>}, {transform_indices = @transform_1, window_bounds = array<i64: 2, 32, 128>}, {transform_indices = @transform_2, window_bounds = array<i64: 1, 2, 128>}, {transform_indices = @transform_3, window_bounds = array<i64: 1, 2, 128>}]} {
    %c0_i32 = arith.constant 0 : i32
    %0 = arith.cmpi eq, %arg2, %c0_i32 : i32
    %1 = arith.extui %0 : i1 to i32
    %c0_i32_0 = arith.constant 0 : i32
    %2 = arith.cmpi ne, %1, %c0_i32_0 : i32
    scf.if %2 {
      %cst_22 = arith.constant 0.000000e+00 : f32
      %25 = vector.broadcast %cst_22 : f32 to vector<2x8x128xf32>
      %c0_23 = arith.constant 0 : index
      %c0_24 = arith.constant 0 : index
      %c0_25 = arith.constant 0 : index
      %26 = vector.load %arg7[%c0_23, %c0_24, %c0_25] : memref<2x8x128xf32, #tpu.memory_space<vmem>>, vector<2x8x128xf32>
      tpu.vector_store %arg7[%c0_23, %c0_24, %c0_25], %25 {strides = array<i32>} : memref<2x8x128xf32, #tpu.memory_space<vmem>>, vector<2x8x128xf32>,
      %cst_26 = arith.constant 0.000000e+00 : f32
      %27 = vector.broadcast %cst_26 : f32 to vector<2x8x128xf32>
      %c0_27 = arith.constant 0 : index
      %c0_28 = arith.constant 0 : index
      %c0_29 = arith.constant 0 : index
      %28 = vector.load %arg8[%c0_27, %c0_28, %c0_29] : memref<2x8x128xf32, #tpu.memory_space<vmem>>, vector<2x8x128xf32>
      tpu.vector_store %arg8[%c0_27, %c0_28, %c0_29], %27 {strides = array<i32>} : memref<2x8x128xf32, #tpu.memory_space<vmem>>, vector<2x8x128xf32>,
    } else {
    }
    %c0 = arith.constant 0 : index
    %c0_1 = arith.constant 0 : index
    %c0_2 = arith.constant 0 : index
    %3 = vector.load %arg3[%c0, %c0_1, %c0_2] : memref<2x32x128xf32, #tpu.memory_space<vmem>>, vector<2x32x128xf32>
    %c0_3 = arith.constant 0 : index
    %c0_4 = arith.constant 0 : index
    %c0_5 = arith.constant 0 : index
    %4 = vector.load %arg4[%c0_3, %c0_4, %c0_5] : memref<2x32x128xi8, #tpu.memory_space<vmem>>, vector<2x32x128xi8>
    %5 = arith.sitofp %4 : vector<2x32x128xi8> to vector<2x32x128xf32>
    %cst = arith.constant 1.000000e+00 : f32
    %6 = vector.broadcast %cst : f32 to vector<2x32x128xf32>
    %7 = arith.subf %6, %3 : vector<2x32x128xf32>
    %8 = math.sqrt %7 : vector<2x32x128xf32>
    %9 = arith.mulf %8, %3 : vector<2x32x128xf32>
    %10 = arith.mulf %9, %5 : vector<2x32x128xf32>
    %11 = arith.addf %9, %5 : vector<2x32x128xf32>
    %c0_6 = arith.constant 0 : index
    %c0_7 = arith.constant 0 : index
    %c0_8 = arith.constant 0 : index
    %12 = vector.load %arg7[%c0_6, %c0_7, %c0_8] : memref<2x8x128xf32, #tpu.memory_space<vmem>>, vector<2x8x128xf32>
    %13 = vector.shape_cast %10 : vector<2x32x128xf32> to vector<2x4x8x128xf32>
    %cst_9 = arith.constant dense<0.000000e+00> : vector<2x8x128xf32>
    %14 = vector.multi_reduction <add>, %13, %cst_9 [1] : vector<2x4x8x128xf32> to vector<2x8x128xf32>
    %15 = arith.addf %12, %14 : vector<2x8x128xf32>
    %c0_10 = arith.constant 0 : index
    %c0_11 = arith.constant 0 : index
    %c0_12 = arith.constant 0 : index
    %16 = vector.load %arg7[%c0_10, %c0_11, %c0_12] : memref<2x8x128xf32, #tpu.memory_space<vmem>>, vector<2x8x128xf32>
    tpu.vector_store %arg7[%c0_10, %c0_11, %c0_12], %15 {strides = array<i32>} : memref<2x8x128xf32, #tpu.memory_space<vmem>>, vector<2x8x128xf32>,
    %c0_13 = arith.constant 0 : index
    %c0_14 = arith.constant 0 : index
    %c0_15 = arith.constant 0 : index
    %17 = vector.load %arg8[%c0_13, %c0_14, %c0_15] : memref<2x8x128xf32, #tpu.memory_space<vmem>>, vector<2x8x128xf32>
    %18 = vector.shape_cast %11 : vector<2x32x128xf32> to vector<2x4x8x128xf32>
    %cst_16 = arith.constant dense<0.000000e+00> : vector<2x8x128xf32>
    %19 = vector.multi_reduction <add>, %18, %cst_16 [1] : vector<2x4x8x128xf32> to vector<2x8x128xf32>
    %20 = arith.addf %17, %19 : vector<2x8x128xf32>
    %c0_17 = arith.constant 0 : index
    %c0_18 = arith.constant 0 : index
    %c0_19 = arith.constant 0 : index
    %21 = vector.load %arg8[%c0_17, %c0_18, %c0_19] : memref<2x8x128xf32, #tpu.memory_space<vmem>>, vector<2x8x128xf32>
    tpu.vector_store %arg8[%c0_17, %c0_18, %c0_19], %20 {strides = array<i32>} : memref<2x8x128xf32, #tpu.memory_space<vmem>>, vector<2x8x128xf32>,
    %c0_i32_20 = arith.constant 0 : i32
    %22 = arith.cmpi eq, %arg2, %c0_i32_20 : i32
    %23 = arith.extui %22 : i1 to i32
    %c0_i32_21 = arith.constant 0 : i32
    %24 = arith.cmpi ne, %23, %c0_i32_21 : i32
    scf.if %24 {
      %c0_22 = arith.constant 0 : index
      %c0_23 = arith.constant 0 : index
      %c0_24 = arith.constant 0 : index
      %25 = vector.load %arg7[%c0_22, %c0_23, %c0_24] : memref<2x8x128xf32, #tpu.memory_space<vmem>>, vector<2x8x128xf32>
      %cst_25 = arith.constant dense<0.000000e+00> : vector<2x128xf32>
      %26 = vector.multi_reduction <add>, %25, %cst_25 [1] : vector<2x8x128xf32> to vector<2x128xf32>
      %c0_26 = arith.constant 0 : index
      %c0_27 = arith.constant 0 : index
      %c0_28 = arith.constant 0 : index
      %27 = vector.load %arg5[%c0_26, %c0_27, %c0_28] : memref<1x2x128xf32, #tpu.memory_space<vmem>>, vector<1x2x128xf32>
      %28 = vector.shape_cast %27 : vector<1x2x128xf32> to vector<2x128xf32>
      %29 = vector.shape_cast %26 : vector<2x128xf32> to vector<1x2x128xf32>
      tpu.vector_store %arg5[%c0_26, %c0_27, %c0_28], %29 {strides = array<i32>} : memref<1x2x128xf32, #tpu.memory_space<vmem>>, vector<1x2x128xf32>,
      %c0_29 = arith.constant 0 : index
      %c0_30 = arith.constant 0 : index
      %c0_31 = arith.constant 0 : index
      %30 = vector.load %arg8[%c0_29, %c0_30, %c0_31] : memref<2x8x128xf32, #tpu.memory_space<vmem>>, vector<2x8x128xf32>
      %cst_32 = arith.constant dense<0.000000e+00> : vector<2x128xf32>
      %31 = vector.multi_reduction <add>, %30, %cst_32 [1] : vector<2x8x128xf32> to vector<2x128xf32>
      %c0_33 = arith.constant 0 : index
      %c0_34 = arith.constant 0 : index
      %c0_35 = arith.constant 0 : index
      %32 = vector.load %arg6[%c0_33, %c0_34, %c0_35] : memref<1x2x128xf32, #tpu.memory_space<vmem>>, vector<1x2x128xf32>
      %33 = vector.shape_cast %32 : vector<1x2x128xf32> to vector<2x128xf32>
      %34 = vector.shape_cast %31 : vector<2x128xf32> to vector<1x2x128xf32>
      tpu.vector_store %arg6[%c0_33, %c0_34, %c0_35], %34 {strides = array<i32>} : memref<1x2x128xf32, #tpu.memory_space<vmem>>, vector<1x2x128xf32>,
    } else {
    }
    return
  }
  func.func @transform_0(%arg0: i32, %arg1: i32, %arg2: i32) -> (i32, i32, i32) {
    %c1_i32 = arith.constant 1 : i32
    %0 = arith.muli %arg0, %c1_i32 : i32
    %1 = arith.addi %0, %arg2 : i32
    %c0_i32 = arith.constant 0 : i32
    %c0_i32_0 = arith.constant 0 : i32
    return %arg1, %1, %c0_i32 : i32, i32, i32
  }
  func.func @transform_1(%arg0: i32, %arg1: i32, %arg2: i32) -> (i32, i32, i32) {
    %c1_i32 = arith.constant 1 : i32
    %0 = arith.muli %arg0, %c1_i32 : i32
    %1 = arith.addi %0, %arg2 : i32
    %c0_i32 = arith.constant 0 : i32
    %c0_i32_0 = arith.constant 0 : i32
    return %arg1, %1, %c0_i32 : i32, i32, i32
  }
  func.func @transform_2(%arg0: i32, %arg1: i32, %arg2: i32) -> (i32, i32, i32) {
    %c0_i32 = arith.constant 0 : i32
    %c0_i32_0 = arith.constant 0 : i32
    return %arg0, %arg1, %c0_i32 : i32, i32, i32
  }
  func.func @transform_3(%arg0: i32, %arg1: i32, %arg2: i32) -> (i32, i32, i32) {
    %c0_i32 = arith.constant 0 : i32
    %c0_i32_0 = arith.constant 0 : i32
    return %arg0, %arg1, %c0_i32 : i32, i32, i32
  }
}

</mosaic_0001>

<bundles_post_ra>
// kernel: tpu_custom_call.1
= control target key start
LH: loop header
LB: loop body
LE: loop exit
PB: predicated region body
PF: predicated region fallthrough
CT: control target
= control target key end

     0   :  { %9 = vsyncpa [#allocation5], 0  ;;  %s673_s0 = inlined_call_operand.hbm [shape: f32[2,32,128], index: 0, kind: input, shape index: {}]   ;;  %s674_s1 = inlined_call_operand.hbm [shape: s8[2,32,128], index: 1, kind: input, shape index: {}]   ;;  %s675_s2 = inlined_call_operand.hbm [shape: f32[1,2,128], index: 2, kind: output, shape index: {0}]   ;;  %s676_s3 = inlined_call_operand.hbm [shape: f32[1,2,128], index: 3, kind: output, shape index: {1}]  }
   0x1   :  { %10 = vsyncpa [#allocation8], 0 }
   0x2   :  { %11 = vsyncpa [#allocation6], 0 }
   0x3   :  { %12 = vsyncpa [#allocation11], 0  ;;  %s21_s14 = sshll.u32 %s673_s0, 4  ;;  %s445_s15 = smov [#allocation4]   ;;  %s22_s14 = int_to_ptr.hbm [resolvable:$true] %s21_s14 }
   0x4   :  { %s23_s16 = sshll.u32 %s445_s15, 4  ;;  %s37_s19 = sshll.u32 %s674_s1, 4  ;;  %s24_s16 = int_to_ptr.vmem [resolvable:$true] %s23_s16  ;;  %s38_s19 = int_to_ptr.hbm [resolvable:$true] %s37_s19 }
   0x5   :  { %s446_s20 = smov 128   ;;  %s447_s21 = smov 8  }
   0x6   :  { %29 = dma.hbm_to_vmem [thread:$0]  %s22_s14, 1024, %s24_s16, [#allocation5], %s446_s20, %s446_s20, %s447_s21  }
   0x7   :  { %s448_s22 = smov [#allocation7]  }
   0x8   :  { %s39_s23 = sshll.u32 %s448_s22, 4  ;;  %s40_s23 = int_to_ptr.vmem [resolvable:$true] %s39_s23 }
   0x9   :  { %45 = dma.hbm_to_vmem [thread:$0]  %s38_s19, 256, %s40_s23, [#allocation8], %s446_s20, %s446_s20, %s447_s21  }
   0xa   :  { %437 = dma.done.wait [#allocation5], 1024  }
   0xb   :  { %438 = vsyncadd [#allocation5], 4294966272 }
   0xc   :  { %439 = dma.done.wait [#allocation8], 256  }
   0xd   :  { %440 = vsyncadd [#allocation8], 4294967040  ;;  %v477_v0 = vld [vmem:[#allocation4] sm:$0xff]  ;;  %v479_v1 = vld [vmem:[#allocation4 + $0x8] sm:$0xff]  ;;  %s449_s0 = smov [#allocation9]   ;;  %s292_s26 = sshll.u32 %s675_s2, 4  ;;  %s293_s26 = int_to_ptr.hbm [resolvable:$true] %s292_s26 }
   0xe   :  { %v481_v2 = vld [vmem:[#allocation4 + $0x10] sm:$0xff]  ;;  %v483_v3 = vld [vmem:[#allocation4 + $0x18] sm:$0xff]  ;;  %v486_v4 = vsub.f32 1.0, %v477_v0  ;;  %v488_v5 = vld [vmem:[#allocation4 + $0x20] sm:$0xff]  ;;  %v493_v7 = vsub.f32 1.0, %v479_v1  ;;  %s290_s1 = sshll.u32 %s449_s0, 4  ;;  %s291_s1 = int_to_ptr.vmem [resolvable:$true] %s290_s1 }
   0xf   :  { %v490_v6 = vld [vmem:[#allocation4 + $0x28] sm:$0xff]  ;;  %v73_v8 = vld [vmem:[#allocation7] sm:$0xff]  ;;  %v496_v9 = vsub.f32 1.0, %v481_v2  ;;  %v498_v10 = vld [vmem:[#allocation4 + $0x30] sm:$0xff]  ;;  %v503_v12 = vsub.f32 1.0, %v483_v3  ;;  %v508_v14 = vsub.f32 1.0, %v488_v5 }
  0x10   :  { %v500_v11 = vld [vmem:[#allocation7 + $0x8] sm:$0xff]  ;;  %v505_v13 = vld [vmem:[#allocation4 + $0x38] sm:$0xff]  ;;  %v511_v15 = vsub.f32 1.0, %v490_v6  ;;  %325 = vrsqrt.f32 %v486_v4  ;;  %v75_v16 = vunpack.c.0.s8 %v73_v8  ;;  %v76_v17 = vunpack.c.1.s8 %v73_v8  ;;  %s450_s27 = smov [#allocation10]   ;;  %s303_s4 = sshll.u32 %s676_s3, 4  ;;  %s304_s4 = int_to_ptr.hbm [resolvable:$true] %s303_s4 }
  0x11   :  { %v77_v18 = vunpack.c.2.s8 %v73_v8  ;;  %327 = vrsqrt.f32 %v493_v7  ;;  %v78_v19 = vunpack.c.3.s8 %v73_v8  ;;  %v79_v20 = vunpack.c.0.s8 %v500_v11  ;;  %s301_s28 = sshll.u32 %s450_s27, 4  ;;  %s302_s28 = int_to_ptr.vmem [resolvable:$true] %s301_s28 }
  0x12   :  { %v517_v21 = vsub.f32 1.0, %v498_v10  ;;  %329 = vrsqrt.f32 %v496_v9  ;;  %v80_v22 = vunpack.c.1.s8 %v500_v11  ;;  %v81_v23 = vunpack.c.2.s8 %v500_v11 }
  0x13   :  { %v523_v24 = vsub.f32 1.0, %v505_v13  ;;  %331 = vrsqrt.f32 %v503_v12  ;;  %v82_v25 = vunpack.c.3.s8 %v500_v11  ;;  %v528_v26 = vcvt.s32.f32 %v75_v16 }
  0x14   :  { %333 = vrsqrt.f32 %v508_v14  ;;  %v530_v27 = vcvt.s32.f32 %v76_v17  ;;  %v533_v29 = vcvt.s32.f32 %v77_v18  ;;  %v535_v30 = vcvt.s32.f32 %v78_v19 }
  0x15   :  { %335 = vrsqrt.f32 %v511_v15  ;;  %v537_v31 = vcvt.s32.f32 %v79_v20  ;;  %v540_v33 = vcvt.s32.f32 %v80_v22  ;;  %v542_v34 = vcvt.s32.f32 %v81_v23 }
  0x16   :  { %v326_v28 = vpop.eup %325  ;;  %337 = vrsqrt.f32 %v517_v21  ;;  %vm106_vm0 = vcmp.eq.f32.partialorder %v486_v4, inf  ;;  %v109_v37 = vand.u32 2147483648, %v486_v4  ;;  %v121_v39 = vand.u32 2147483648, %v493_v7 }
  0x17   :  { %v328_v32 = vpop.eup %327  ;;  %v100_v35 = vmul.f32 %v326_v28, %v486_v4  ;;  %339 = vrsqrt.f32 %v523_v24  ;;  %vm108_vm1 = vcmp.eq.f32.partialorder %v486_v4, 0.0  ;;  %vm118_vm2 = vcmp.eq.f32.partialorder %v493_v7, inf }
  0x18   :  { %v330_v36 = vpop.eup %329  ;;  %v112_v38 = vmul.f32 %v328_v32, %v493_v7  ;;  %v133_v43 = vand.u32 2147483648, %v496_v9  ;;  %v145_v44 = vand.u32 2147483648, %v503_v12  ;;  %vm120_vm3 = vcmp.eq.f32.partialorder %v493_v7, 0.0 }
  0x19   :  { %v332_v40 = vpop.eup %331  ;;  %v101_v41 = vmul.f32 %v326_v28, %v100_v35  ;;  %v124_v42 = vmul.f32 %v330_v36, %v496_v9  ;;  %vm130_vm4 = vcmp.eq.f32.partialorder %v496_v9, inf  ;;  %v157_v48 = vand.u32 2147483648, %v508_v14 }
  0x1a   :  { %v334_v45 = vpop.eup %333  ;;  %v113_v46 = vmul.f32 %v328_v32, %v112_v38  ;;  %v136_v47 = vmul.f32 %v332_v40, %v503_v12  ;;  %v169_v49 = vand.u32 2147483648, %v511_v15  ;;  %vm132_vm5 = vcmp.eq.f32.partialorder %v496_v9, 0.0 }
  0x1b   :  { %v336_v50 = vpop.eup %335  ;;  %v102_v51 = vmul.f32 0.5, %v101_v41  ;;  %v125_v52 = vmul.f32 %v330_v36, %v124_v42  ;;  %vm142_vm6 = vcmp.eq.f32.partialorder %v503_v12, inf  ;;  %v148_v53 = vmul.f32 %v334_v45, %v508_v14 }
  0x1c   :  { %v181_v54 = vand.u32 2147483648, %v517_v21  ;;  %v338_v55 = vpop.eup %337  ;;  %v114_v56 = vmul.f32 0.5, %v113_v46  ;;  %v137_v57 = vmul.f32 %v332_v40, %v136_v47  ;;  %vm144_vm7 = vcmp.eq.f32.partialorder %v503_v12, 0.0 }
  0x1d   :  { %vm154_vm8 = vcmp.eq.f32.partialorder %v508_v14, inf  ;;  %v160_v58 = vmul.f32 %v336_v50, %v511_v15  ;;  %v193_v59 = vand.u32 2147483648, %v523_v24  ;;  %v340_v60 = vpop.eup %339  ;;  %v103_v61 = vsub.f32 1.5, %v102_v51 }
  0x1e   :  { %v126_v62 = vmul.f32 0.5, %v125_v52  ;;  %v149_v63 = vmul.f32 %v334_v45, %v148_v53  ;;  %vm156_vm9 = vcmp.eq.f32.partialorder %v508_v14, 0.0  ;;  %vm166_vm10 = vcmp.eq.f32.partialorder %v511_v15, inf }
  0x1f   :  { %v172_v8 = vmul.f32 %v338_v55, %v517_v21  ;;  %v115_v16 = vsub.f32 1.5, %v114_v56  ;;  %v138_v17 = vmul.f32 0.5, %v137_v57  ;;  %v161_v18 = vmul.f32 %v336_v50, %v160_v58 }
  0x20   :  { %vm168_vm11 = vcmp.eq.f32.partialorder %v511_v15, 0.0  ;;  %vm178_vm12 = vcmp.eq.f32.partialorder %v517_v21, inf  ;;  %v184_v19 = vmul.f32 %v340_v60, %v523_v24  ;;  %v104_v20 = vmul.f32 %v326_v28, %v103_v61 }
  0x21   :  { %v127_v22 = vsub.f32 1.5, %v126_v62  ;;  %v150_v23 = vmul.f32 0.5, %v149_v63  ;;  %v173_v35 = vmul.f32 %v338_v55, %v172_v8  ;;  %vm180_vm13 = vcmp.eq.f32.partialorder %v517_v21, 0.0 }
  0x22   :  { %v116_v38 = vmul.f32 %v328_v32, %v115_v16  ;;  %v139_v41 = vsub.f32 1.5, %v138_v17  ;;  %v162_v42 = vmul.f32 0.5, %v161_v18  ;;  %v185_v46 = vmul.f32 %v340_v60, %v184_v19 }
  0x23   :  { %v105_v47 = vmul.f32 %v104_v20, %v486_v4  ;;  %v128_v51 = vmul.f32 %v330_v36, %v127_v22  ;;  %v151_v52 = vsub.f32 1.5, %v150_v23  ;;  %v174_v53 = vmul.f32 0.5, %v173_v35 }
  0x24   :  { %vm190_vm14 = vcmp.eq.f32.partialorder %v523_v24, inf  ;;  %v117_v56 = vmul.f32 %v116_v38, %v493_v7  ;;  %v140_v57 = vmul.f32 %v332_v40, %v139_v41  ;;  %v163_v28 = vsub.f32 1.5, %v162_v42 }
  0x25   :  { %v186_v58 = vmul.f32 0.5, %v185_v46  ;;  %vm192_vm15 = vcmp.eq.f32.partialorder %v523_v24, 0.0  ;;  %v107_v32 = vsel %vm106_vm0, %v486_v4, %v105_v47  ;;  %v129_v61 = vmul.f32 %v128_v51, %v496_v9 }
  0x26   :  { %v152_v62 = vmul.f32 %v334_v45, %v151_v52  ;;  %v175_v63 = vsub.f32 1.5, %v174_v53  ;;  %v110_v36 = vsel %vm108_vm1, %v109_v37, %v107_v32  ;;  %v119_v40 = vsel %vm118_vm2, %v493_v7, %v117_v56 }
  0x27   :  { %v141_v8 = vmul.f32 %v140_v57, %v503_v12  ;;  %v164_v16 = vmul.f32 %v336_v50, %v163_v28  ;;  %v122_v17 = vsel %vm120_vm3, %v121_v39, %v119_v40  ;;  %v131_v45 = vsel %vm130_vm4, %v496_v9, %v129_v61 }
  0x28   :  { %v153_v18 = vmul.f32 %v152_v62, %v508_v14  ;;  %v176_v4 = vmul.f32 %v338_v55, %v175_v63  ;;  %v134_v37 = vsel %vm132_vm5, %v133_v43, %v131_v45  ;;  %v187_v7 = vsub.f32 1.5, %v186_v58 }
  0x29   :  { %v143_v50 = vsel %vm142_vm6, %v503_v12, %v141_v8  ;;  %v165_v19 = vmul.f32 %v164_v16, %v511_v15  ;;  %v195_v9 = vmul.f32 %v110_v36, %v477_v0  ;;  %v196_v12 = vmul.f32 %v122_v17, %v479_v1 }
  0x2a   :  { %v146_v39 = vsel %vm144_vm7, %v145_v44, %v143_v50  ;;  %v155_v55 = vsel %vm154_vm8, %v508_v14, %v153_v18  ;;  %v177_v20 = vmul.f32 %v176_v4, %v517_v21  ;;  %v188_v23 = vmul.f32 %v340_v60, %v187_v7 }
  0x2b   :  { %v158_v43 = vsel %vm156_vm9, %v157_v48, %v155_v55  ;;  %v167_v22 = vsel %vm166_vm10, %v511_v15, %v165_v19  ;;  %v197_v35 = vmul.f32 %v134_v37, %v481_v2  ;;  %v198_v14 = vmul.f32 %v146_v39, %v483_v3 }
  0x2c   :  { %v170_v44 = vsel %vm168_vm11, %v169_v49, %v167_v22  ;;  %v179_v0 = vsel %vm178_vm12, %v517_v21, %v177_v20  ;;  %v189_v1 = vmul.f32 %v188_v23, %v523_v24  ;;  %v199_v60 = vmul.f32 %v158_v43, %v488_v5 }
  0x2d   :  { %v182_v48 = vsel %vm180_vm13, %v181_v54, %v179_v0  ;;  %v200_v15 = vmul.f32 %v170_v44, %v490_v6  ;;  %v203_v38 = vmul.f32 %v195_v9, %v528_v26  ;;  %v204_v41 = vmul.f32 %v196_v12, %v530_v27 }
  0x2e   :  { %v201_v49 = vmul.f32 %v182_v48, %v498_v10  ;;  %v205_v2 = vmul.f32 %v197_v35, %v533_v29  ;;  %v90_v3 = vcvt.s32.f32 %v82_v25  ;;  %v191_v21 = vsel %vm190_vm14, %v523_v24, %v189_v1 }
  0x2f   :  { %v207_v54 = vmul.f32 %v199_v60, %v537_v31  ;;  %v208_v5 = vmul.f32 %v200_v15, %v540_v33  ;;  %v194_v6 = vsel %vm192_vm15, %v193_v59, %v191_v21  ;;  %v206_v10 = vmul.f32 %v198_v14, %v535_v30 }
  0x30   :  { %v209_v42 = vmul.f32 %v201_v49, %v542_v34  ;;  %v221_v46 = vadd.f32 %v204_v41, %v203_v38  ;;  %v202_v11 = vmul.f32 %v194_v6, %v505_v13  ;;  %v211_v47 = vadd.f32 %v195_v9, %v528_v26 }
  0x31   :  { %v224_v25 = vadd.f32 %v208_v5, %v207_v54  ;;  %v212_v51 = vadd.f32 %v196_v12, %v530_v27  ;;  %v213_v53 = vadd.f32 %v197_v35, %v533_v29  ;;  %v215_v56 = vadd.f32 %v199_v60, %v537_v31 }
  0x32   :  { %v222_v52 = vadd.f32 %v221_v46, %v205_v2  ;;  %v210_v57 = vmul.f32 %v202_v11, %v90_v3  ;;  %v216_v59 = vadd.f32 %v200_v15, %v540_v33  ;;  %v217_v28 = vadd.f32 %v201_v49, %v542_v34 }
  0x33   :  { %v225_v24 = vadd.f32 %v224_v25, %v209_v42  ;;  %v214_v32 = vadd.f32 %v198_v14, %v535_v30  ;;  %v233_v13 = vadd.f32 %v212_v51, %v211_v47  ;;  %v218_v62 = vadd.f32 %v202_v11, %v90_v3 }
  0x34   :  { %v223_v58 = vadd.f32 %v222_v52, %v206_v10  ;;  %v236_v26 = vadd.f32 %v216_v59, %v215_v56  ;;  %vm262_vm0 = vcmask 1041409  }
  0x35   :  { %v226_v61 = vadd.f32 %v225_v24, %v210_v57  ;;  %v234_v27 = vadd.f32 %v233_v13, %v213_v53 }
  0x36   :  { %v248_v63 = vrot.slane %v223_v58, 4  ;;  %v237_v40 = vadd.f32 %v236_v26, %v217_v28 }
  0x37   :  { %v254_v36 = vrot.slane %v226_v61, 4  ;;  %v235_v8 = vadd.f32 %v234_v27, %v214_v32 }
  0x38   :  { %v249_v29 = vadd.f32 %v248_v63, %v223_v58  ;;  %v238_v16 = vadd.f32 %v237_v40, %v218_v62 }
  0x39   :  { %v255_v31 = vadd.f32 %v254_v36, %v226_v61  ;;  %v268_v45 = vrot.slane %v235_v8, 4 }
  0x3a   :  { %v250_v17 = vrot.slane %v249_v29, 2  ;;  %v274_v18 = vrot.slane %v238_v16, 4 }
  0x3b   :  { %v256_v33 = vrot.slane %v255_v31, 2  ;;  %v269_v4 = vadd.f32 %v268_v45, %v235_v8 }
  0x3c   :  { %v251_v34 = vadd.f32 %v250_v17, %v249_v29  ;;  %v275_v30 = vadd.f32 %v274_v18, %v238_v16 }
  0x3d   :  { %v257_v37 = vadd.f32 %v256_v33, %v255_v31  ;;  %v270_v19 = vrot.slane %v269_v4, 2 }
  0x3e   :  { %v252_v50 = vrot.slane %v251_v34, 1  ;;  %v276_v39 = vrot.slane %v275_v30, 2 }
  0x3f   :  { %v258_v7 = vrot.slane %v257_v37, 1  ;;  %v271_v20 = vadd.f32 %v270_v19, %v269_v4 }
  0x40   :  { %v253_v55 = vadd.f32 %v252_v50, %v251_v34  ;;  %v277_v43 = vadd.f32 %v276_v39, %v275_v30 }
  0x41   :  { %v259_v9 = vadd.f32 %v258_v7, %v257_v37  ;;  %v272_v22 = vrot.slane %v271_v20, 1 }
  0x42   :  { %v278_v12 = vrot.slane %v277_v43, 1 }
  0x43   :  { %v263_v23 = vsel %vm262_vm0, %v259_v9, %v253_v55  ;;  %v273_v44 = vadd.f32 %v272_v22, %v271_v20 }
  0x44   :  { %265 = vst [vmem:[#allocation9] sm:$0x3] %v263_v23  ;;  %v279_v0 = vadd.f32 %v278_v12, %v277_v43 }
  0x45   :  { %295 = dma.vmem_to_hbm [thread:$0]  %s291_s1, 32, %s293_s26, [#allocation6]  }
  0x46   :  { %v282_v35 = vsel %vm262_vm0, %v279_v0, %v273_v44 }
  0x47   :  { %284 = vst [vmem:[#allocation10] sm:$0x3] %v282_v35 }
  0x48   :  { %306 = dma.vmem_to_hbm [thread:$0]  %s302_s28, 32, %s304_s4, [#allocation11]  }
  0x49   :  { %441 = dma.done.wait [#allocation6], 32  }
  0x4a   :  { %442 = vsyncadd [#allocation6], 4294967264 }
  0x4b   :  { %443 = dma.done.wait [#allocation11], 32  }
  0x4c   :  { %444 = vsyncadd [#allocation11], 4294967264 }
  0x4d   :  { %315 = vsyncpa [#allocation5], 1 }
  0x4e   :  { %316 = vsyncpa [#allocation8], 1 }
  0x4f   :  { %317 = vsyncpa [#allocation6], 1 }
  0x50   :  { %318 = vsyncpa [#allocation11], 1 }

</bundles_post_ra>
